<compile_context>
chip_gen: v7x
topology: tpu7x:2x2x1
jax: 0.10.0
libtpu: 0.0.40
codegen_flags: <defaults>
</compile_context>

<pallas_src>
import functools

import jax
import jax.numpy as jnp
from jax.experimental import pallas as pl
from jax.experimental.pallas import tpu as pltpu


def _round_up(x, m):
    return ((x + m - 1) // m) * m


# --------------------------------------------------------------------------
# Kernel
# --------------------------------------------------------------------------
def _policy_head_kernel(cls_ref, w_ref, b_ref, o_ref):
    """Linear projection of pre-pooled CLS rows.

    cls_ref : (TM, H)  bf16 CLS activations (one batch tile)
    w_ref   : (H, Ep)  bf16 linear weight (resident across the grid)
    b_ref   : (1, Ep)  f32  linear bias   (resident across the grid)
    o_ref   : (TM, Ep) f32  sentence embeddings
    """
    proj = jnp.dot(cls_ref[...], w_ref[...], preferred_element_type=jnp.float32)
    o_ref[...] = (proj + b_ref[...]).astype(o_ref.dtype)


# --------------------------------------------------------------------------
# One-time parameter preparation (hoisted out of the per-call forward)
# --------------------------------------------------------------------------
def prepare_policy_head_params(linear_w, linear_b):
    """Cast the nn.Linear weight to bf16 and pad E up to a lane multiple (128).

    Call once when the parameters are created/loaded; the results are reused
    by every forward call, so no per-call weight cast/pad traffic remains.
    linear_w: (H, E) f32 (pre-transposed nn.Linear weight), linear_b: (E,) f32.
    """
    H, E = linear_w.shape
    Ep = _round_up(E, 128)
    w = linear_w.astype(jnp.bfloat16)
    b = linear_b.astype(jnp.float32)
    if Ep != E:
        w = jnp.pad(w, ((0, 0), (0, Ep - E)))
        b = jnp.pad(b, (0, Ep - E))
    w = jax.block_until_ready(w)
    b2d = jax.block_until_ready(b.reshape(1, Ep))
    return {"w": w, "b": b2d, "E": E}


# --------------------------------------------------------------------------
# Tiling choice
# --------------------------------------------------------------------------
def _pick_tile(B, block_m):
    # bf16 vregs pack (16, 128): round the batch tile to 16 sublanes.
    tm = _round_up(min(block_m, max(B, 1)), 16)
    # v7x has 2 TensorCores; make sure the "parallel" batch axis has >= 2
    # grid steps for moderate batches so both cores get work.  v5e/v6e
    # (1 TC) are unaffected, and large B still gets big (block_m) tiles.
    if B > 16 and pl.cdiv(B, tm) < 2:
        tm = _round_up(pl.cdiv(B, 2), 16)
    return tm


# --------------------------------------------------------------------------
# Jitted per-call path: CLS pool + cast + pad (single fused XLA op) + kernel
# --------------------------------------------------------------------------
@functools.partial(jax.jit, static_argnames=("tm", "E", "buffered"))
def _policy_head_call(last_hidden_states, w, b, *, tm, E, buffered):
    B, _, H = last_hidden_states.shape
    Ep = w.shape[1]
    Bp = _round_up(B, tm)

    # CLS pooling + bf16 cast + batch pad: fuses into one small XLA fusion
    # producing the (Bp, H) bf16 slab that the kernel DMAs.
    cls = last_hidden_states[:, 0, :].astype(jnp.bfloat16)
    if Bp != B:
        cls = jnp.pad(cls, ((0, Bp - B), (0, 0)))

    # Constant-index parameter specs: single-buffered when supported
    # (halves resident weight VMEM; matters on v7x's 64 MiB VMEM).
    param_kwargs = {"pipeline_mode": pl.Buffered(1)} if buffered else {}

    out = pl.pallas_call(
        _policy_head_kernel,
        out_shape=jax.ShapeDtypeStruct((Bp, Ep), jnp.float32),
        grid=(Bp // tm,),
        in_specs=[
            pl.BlockSpec((tm, H), lambda i: (i, 0)),                  # CLS rows, batch-tiled
            pl.BlockSpec((H, Ep), lambda i: (0, 0), **param_kwargs),  # weight: resident
            pl.BlockSpec((1, Ep), lambda i: (0, 0), **param_kwargs),  # bias: resident
        ],
        out_specs=pl.BlockSpec((tm, Ep), lambda i: (i, 0)),
        compiler_params=pltpu.CompilerParams(
            dimension_semantics=("parallel",),
        ),
    )(cls, w, b)

    return out[:B, :E]


_BUFFERED_OK = None  # lazily resolved: does this build accept pl.Buffered(1)?


def policy_network_forward(last_hidden_states, head_params, *, block_m=512):
    """last_hidden_states: (B, S, H) f32 encoder output; head_params from
    prepare_policy_head_params. Returns (B, E) f32 sentence embeddings."""
    global _BUFFERED_OK
    B = last_hidden_states.shape[0]
    tm = _pick_tile(B, block_m)
    args = (last_hidden_states, head_params["w"], head_params["b"])
    kwargs = dict(tm=tm, E=head_params["E"])

    if _BUFFERED_OK is None:
        try:
            out = _policy_head_call(*args, buffered=True, **kwargs)
            _BUFFERED_OK = True
            return out
        except Exception:
            # pl.Buffered(1) not supported by this JAX/Mosaic build; fall back
            # to default double-buffered parameter specs (correctness identical).
            _BUFFERED_OK = False
    return _policy_head_call(*args, buffered=_BUFFERED_OK, **kwargs)


if __name__ == "__main__":
    # Small shapes consistent with the module's forward:
    #   batch=2 sentences, seq=8 tokens, hidden=32 (encoder width),
    #   embedding_size=128 (add_linear=True head).
    B, S, H, E = 2, 8, 32, 128

    key = jax.random.PRNGKey(0)
    k_h, k_w, k_b = jax.random.split(key, 3)

    # Synthetic encoder output standing in for output.hidden_states[-1].
    last_hidden_states = jax.random.normal(k_h, (B, S, H), dtype=jnp.float32)

    # Deterministic nn.Linear(H, E)-style parameters (uniform in +-1/sqrt(H)),
    # stored pre-transposed as (H, E).
    bound = 1.0 / (H ** 0.5)
    linear_w = jax.random.uniform(k_w, (H, E), jnp.float32, -bound, bound)
    linear_b = jax.random.uniform(k_b, (E,), jnp.float32, -bound, bound)

    # One-time parameter prep (hoisted out of the per-call path).
    head_params = prepare_policy_head_params(linear_w, linear_b)

    out = policy_network_forward(last_hidden_states, head_params)
    out = jax.block_until_ready(out)

    # Reference with the same numerics as the kernel (bf16 in, f32 accumulate).
    cls = last_hidden_states[:, 0, :]
    ref_bf16 = jnp.dot(cls.astype(jnp.bfloat16), linear_w.astype(jnp.bfloat16),
                       preferred_element_type=jnp.float32) + linear_b
    # Full-precision PyTorch-equivalent reference (looser tolerance for bf16 cast).
    ref_f32 = cls @ linear_w + linear_b

    assert out.shape == (B, E)
    assert jnp.allclose(out, ref_bf16, atol=1e-3, rtol=1e-3)
    assert jnp.allclose(out, ref_f32, atol=5e-2, rtol=5e-2)

    print("KERNEL_OK")
</pallas_src>

<mosaic_0001>
module attributes {stable_mosaic.version = 11 : i64} {
  func.func @_policy_head_kernel(%arg0: i32, %arg1: memref<16x32xbf16, #tpu.memory_space<vmem>>, %arg2: memref<32x128xbf16, #tpu.memory_space<vmem>>, %arg3: memref<1x128xf32, #tpu.memory_space<vmem>>, %arg4: memref<16x128xf32, #tpu.memory_space<vmem>>) attributes {dimension_semantics = [#tpu.dimension_semantics<parallel>], iteration_bounds = array<i64: 1>, scalar_prefetch = 0 : i64, scratch_operands = 0 : i64, tpu.core_type = #tpu.core_type<tc>, window_params = [{transform_indices = @transform_0, window_bounds = array<i64: 16, 32>}, {pipeline_mode = #tpu.pipeline_mode<synchronous>, transform_indices = @transform_1, window_bounds = array<i64: 32, 128>}, {pipeline_mode = #tpu.pipeline_mode<synchronous>, transform_indices = @transform_2, window_bounds = array<i64: 1, 128>}, {transform_indices = @transform_3, window_bounds = array<i64: 16, 128>}]} {
    %c0 = arith.constant 0 : index
    %c0_0 = arith.constant 0 : index
    %0 = vector.load %arg1[%c0, %c0_0] : memref<16x32xbf16, #tpu.memory_space<vmem>>, vector<16x32xbf16>
    %c0_1 = arith.constant 0 : index
    %c0_2 = arith.constant 0 : index
    %1 = vector.load %arg2[%c0_1, %c0_2] : memref<32x128xbf16, #tpu.memory_space<vmem>>, vector<32x128xbf16>
    %cst = arith.constant dense<0.000000e+00> : vector<16x128xf32>
    %2 = tpu.matmul %0, %1, %cst {dimension_numbers = #tpu.dot_dimension_numbers<[1], [0], [0], [1], [0, 0, 1, 1], [], []>} : vector<16x32xbf16>, vector<32x128xbf16>, vector<16x128xf32> -> vector<16x128xf32>
    %c0_3 = arith.constant 0 : index
    %c0_4 = arith.constant 0 : index
    %3 = vector.load %arg3[%c0_3, %c0_4] : memref<1x128xf32, #tpu.memory_space<vmem>>, vector<1x128xf32>
    %4 = vector.broadcast %3 : vector<1x128xf32> to vector<16x128xf32>
    %5 = arith.addf %2, %4 : vector<16x128xf32>
    %c0_5 = arith.constant 0 : index
    %c0_6 = arith.constant 0 : index
    %6 = vector.load %arg4[%c0_5, %c0_6] : memref<16x128xf32, #tpu.memory_space<vmem>>, vector<16x128xf32>
    tpu.vector_store %arg4[%c0_5, %c0_6], %5 {strides = array<i32>} : memref<16x128xf32, #tpu.memory_space<vmem>>, vector<16x128xf32>,
    return
  }
  func.func @transform_0(%arg0: i32) -> (i32, i32) {
    %c0_i32 = arith.constant 0 : i32
    %c0_i32_0 = arith.constant 0 : i32
    return %arg0, %c0_i32 : i32, i32
  }
  func.func @transform_1(%arg0: i32) -> (i32, i32) {
    %c0_i32 = arith.constant 0 : i32
    %c0_i32_0 = arith.constant 0 : i32
    %c0_i32_1 = arith.constant 0 : i32
    return %c0_i32, %c0_i32_0 : i32, i32
  }
  func.func @transform_2(%arg0: i32) -> (i32, i32) {
    %c0_i32 = arith.constant 0 : i32
    %c0_i32_0 = arith.constant 0 : i32
    %c0_i32_1 = arith.constant 0 : i32
    return %c0_i32, %c0_i32_0 : i32, i32
  }
  func.func @transform_3(%arg0: i32) -> (i32, i32) {
    %c0_i32 = arith.constant 0 : i32
    %c0_i32_0 = arith.constant 0 : i32
    return %arg0, %c0_i32 : i32, i32
  }
}

module attributes {stable_mosaic.version = 11 : i64} {
  func.func @_policy_head_kernel(%arg0: i32, %arg1: memref<16x32xbf16, #tpu.memory_space<vmem>>, %arg2: memref<32x128xbf16, #tpu.memory_space<vmem>>, %arg3: memref<1x128xf32, #tpu.memory_space<vmem>>, %arg4: memref<16x128xf32, #tpu.memory_space<vmem>>) attributes {dimension_semantics = [#tpu.dimension_semantics<parallel>], iteration_bounds = array<i64: 1>, scalar_prefetch = 0 : i64, scratch_operands = 0 : i64, tpu.core_type = #tpu.core_type<tc>, window_params = [{transform_indices = @transform_0, window_bounds = array<i64: 16, 32>}, {pipeline_mode = #tpu.pipeline_mode<synchronous>, transform_indices = @transform_1, window_bounds = array<i64: 32, 128>}, {pipeline_mode = #tpu.pipeline_mode<synchronous>, transform_indices = @transform_2, window_bounds = array<i64: 1, 128>}, {transform_indices = @transform_3, window_bounds = array<i64: 16, 128>}]} {
    %c0 = arith.constant 0 : index
    %c0_0 = arith.constant 0 : index
    %0 = vector.load %arg1[%c0, %c0_0] : memref<16x32xbf16, #tpu.memory_space<vmem>>, vector<16x32xbf16>
    %c0_1 = arith.constant 0 : index
    %c0_2 = arith.constant 0 : index
    %1 = vector.load %arg2[%c0_1, %c0_2] : memref<32x128xbf16, #tpu.memory_space<vmem>>, vector<32x128xbf16>
    %cst = arith.constant dense<0.000000e+00> : vector<16x128xf32>
    %2 = tpu.matmul %0, %1, %cst {dimension_numbers = #tpu.dot_dimension_numbers<[1], [0], [0], [1], [0, 0, 1, 1], [], []>} : vector<16x32xbf16>, vector<32x128xbf16>, vector<16x128xf32> -> vector<16x128xf32>
    %c0_3 = arith.constant 0 : index
    %c0_4 = arith.constant 0 : index
    %3 = vector.load %arg3[%c0_3, %c0_4] : memref<1x128xf32, #tpu.memory_space<vmem>>, vector<1x128xf32>
    %4 = vector.broadcast %3 : vector<1x128xf32> to vector<16x128xf32>
    %5 = arith.addf %2, %4 : vector<16x128xf32>
    %c0_5 = arith.constant 0 : index
    %c0_6 = arith.constant 0 : index
    %6 = vector.load %arg4[%c0_5, %c0_6] : memref<16x128xf32, #tpu.memory_space<vmem>>, vector<16x128xf32>
    tpu.vector_store %arg4[%c0_5, %c0_6], %5 {strides = array<i32>} : memref<16x128xf32, #tpu.memory_space<vmem>>, vector<16x128xf32>,
    return
  }
  func.func @transform_0(%arg0: i32) -> (i32, i32) {
    %c0_i32 = arith.constant 0 : i32
    %c0_i32_0 = arith.constant 0 : i32
    return %arg0, %c0_i32 : i32, i32
  }
  func.func @transform_1(%arg0: i32) -> (i32, i32) {
    %c0_i32 = arith.constant 0 : i32
    %c0_i32_0 = arith.constant 0 : i32
    %c0_i32_1 = arith.constant 0 : i32
    return %c0_i32, %c0_i32_0 : i32, i32
  }
  func.func @transform_2(%arg0: i32) -> (i32, i32) {
    %c0_i32 = arith.constant 0 : i32
    %c0_i32_0 = arith.constant 0 : i32
    %c0_i32_1 = arith.constant 0 : i32
    return %c0_i32, %c0_i32_0 : i32, i32
  }
  func.func @transform_3(%arg0: i32) -> (i32, i32) {
    %c0_i32 = arith.constant 0 : i32
    %c0_i32_0 = arith.constant 0 : i32
    return %arg0, %c0_i32 : i32, i32
  }
}

</mosaic_0001>

<bundles_post_ra>
// kernel: _policy_head_call.1
= control target key start
LH: loop header
LB: loop body
LE: loop exit
PB: predicated region body
PF: predicated region fallthrough
CT: control target
= control target key end

     0   :  { %v117_v0 = vmov 0.0   ;;  %vm118_vm0 = vmmov 0   ;;  %vm45_vm1 = vcmask 261120   ;;  %s157_s1 = inlined_call_operand.vmem [shape: bf16[32,128], index: 1, kind: input, shape index: {}]   ;;  %s158_s0 = inlined_call_operand.vmem [shape: bf16[16,32], index: 0, kind: input, shape index: {}]   ;;  %s159_s2 = inlined_call_operand.vmem [shape: f32[1,128], index: 2, kind: input, shape index: {}]   ;;  %s160_s3 = inlined_call_operand.vmem [shape: f32[16,128], index: 3, kind: output, shape index: {}]  }
   0x1   :  { %104 = vmatprep.subr.bf16.mxu0 %v117_v0  ;;  %v114_v1 = vld [vmem:[%s157_s1] sm:$0xff]   ;;  %108 = vmatprep.mubr.msk.bf16.mxu0 %vm118_vm0, %v117_v0  ;;  %v115_v2 = vld [vmem:[%s157_s1 + $0x8] sm:$0xff]  }
   0x2   :  { %105 = vmatpush3.bf16.msra.mxu0 %v114_v1  ;;  %v116_v3 = vld [vmem:[%s158_s0] sm:$0xff]  }
   0x3   :  { %106 = vmatprep.subr.bf16.mxu0 %v117_v0  ;;  %v96_v4 = vld [vmem:[%s159_s2] ss:$0 sm:$0xff] }
   0x6   :  { %107 = vmatpush3.bf16.msra.mxu0 %v115_v2 }
   0x9   :  { %109 = vmatmul.mubr.msk.bf16.vlgmr.msra.gmra.mrb[0].mxu0 %vm45_vm1, %v116_v3 }
  0xdc   :  { %v83_v5 = vpop.f32.mrb[0].mxu0 }
  0xdd   :  { %v84_v6 = vadd.f32 %v96_v4, %v83_v5  ;;  %v110_v7 = vpop.f32.mrb[1].mxu0 }
  0xde   :  { %v86_v8 = vpop.f32.mrb[2].mxu0 }
  0xdf   :  { %90 = vst [vmem:[%s160_s3] sm:$0xff] %v84_v6  ;;  %v87_v9 = vadd.f32 %v96_v4, %v86_v8  ;;  %v111_v10 = vpop.f32.mrb[3].mxu0 }
  0xe1   :  { %91 = vst [vmem:[%s160_s3 + $0x8] sm:$0xff] %v87_v9 }

// kernel: _policy_head_call.1
= control target key start
LH: loop header
LB: loop body
LE: loop exit
PB: predicated region body
PF: predicated region fallthrough
CT: control target
= control target key end

     0   :  { %v117_v0 = vmov 0.0   ;;  %vm118_vm0 = vmmov 0   ;;  %vm45_vm1 = vcmask 261120   ;;  %s157_s1 = inlined_call_operand.vmem [shape: bf16[32,128], index: 1, kind: input, shape index: {}]   ;;  %s158_s0 = inlined_call_operand.vmem [shape: bf16[16,32], index: 0, kind: input, shape index: {}]   ;;  %s159_s2 = inlined_call_operand.vmem [shape: f32[1,128], index: 2, kind: input, shape index: {}]   ;;  %s160_s3 = inlined_call_operand.vmem [shape: f32[16,128], index: 3, kind: output, shape index: {}]  }
   0x1   :  { %104 = vmatprep.subr.bf16.mxu0 %v117_v0  ;;  %v114_v1 = vld [vmem:[%s157_s1] sm:$0xff]   ;;  %108 = vmatprep.mubr.msk.bf16.mxu0 %vm118_vm0, %v117_v0  ;;  %v115_v2 = vld [vmem:[%s157_s1 + $0x8] sm:$0xff]  }
   0x2   :  { %105 = vmatpush3.bf16.msra.mxu0 %v114_v1  ;;  %v116_v3 = vld [vmem:[%s158_s0] sm:$0xff]  }
   0x3   :  { %106 = vmatprep.subr.bf16.mxu0 %v117_v0  ;;  %v96_v4 = vld [vmem:[%s159_s2] ss:$0 sm:$0xff] }
   0x6   :  { %107 = vmatpush3.bf16.msra.mxu0 %v115_v2 }
   0x9   :  { %109 = vmatmul.mubr.msk.bf16.vlgmr.msra.gmra.mrb[0].mxu0 %vm45_vm1, %v116_v3 }
  0xdc   :  { %v83_v5 = vpop.f32.mrb[0].mxu0 }
  0xdd   :  { %v84_v6 = vadd.f32 %v96_v4, %v83_v5  ;;  %v110_v7 = vpop.f32.mrb[1].mxu0 }
  0xde   :  { %v86_v8 = vpop.f32.mrb[2].mxu0 }
  0xdf   :  { %90 = vst [vmem:[%s160_s3] sm:$0xff] %v84_v6  ;;  %v87_v9 = vadd.f32 %v96_v4, %v86_v8  ;;  %v111_v10 = vpop.f32.mrb[3].mxu0 }
  0xe1   :  { %91 = vst [vmem:[%s160_s3 + $0x8] sm:$0xff] %v87_v9 }

</bundles_post_ra>
